<compile_context>
chip_gen: v6e
topology: v6e:2x2x1
jax: 0.10.0
libtpu: 0.0.40
codegen_flags: <defaults>
</compile_context>

<pallas_src>
import functools

import jax
import jax.numpy as jnp
from jax.experimental import pallas as pl
from jax.experimental.pallas import tpu as pltpu

NEG_SLOPE = 0.2


def _leaky(x):
    # LeakyReLU(0.2): for slope < 1 this equals max(x, 0.2*x)
    return jnp.maximum(x, NEG_SLOPE * x)


# ----------------------------- Pallas kernels ------------------------------

def _se_gate_kernel(x_ref, w1_ref, b1_ref, w2_ref, b2_ref, gate_ref, acc_ref,
                    *, inv_hw):
    # x_ref   : (1, C, hw_tile)   one spatial tile of one batch element
    # w1_ref  : (mid, C), b1_ref : (mid, 1)   (PyTorch Linear layout: y = W x + b)
    # w2_ref  : (C, mid), b2_ref : (C, 1)
    # gate_ref: (1, C, 1) output gate for this batch element
    # acc_ref : (C, 1) VMEM scratch accumulator (persists across grid steps)
    t = pl.program_id(1)

    @pl.when(t == 0)
    def _init():
        acc_ref[...] = jnp.zeros_like(acc_ref)

    # per-channel partial sum over the spatial (lane) axis of this tile
    acc_ref[...] += jnp.sum(x_ref[0], axis=-1, keepdims=True)

    @pl.when(t == pl.num_programs(1) - 1)
    def _finalize():
        pooled = acc_ref[...] * inv_hw                                  # (C, 1)
        h = jnp.dot(w1_ref[...], pooled,
                    preferred_element_type=jnp.float32) + b1_ref[...]   # (mid, 1)
        h = _leaky(h)
        g = jnp.dot(w2_ref[...], h,
                    preferred_element_type=jnp.float32) + b2_ref[...]   # (C, 1)
        gate_ref[0] = jax.nn.sigmoid(g)


def _se_apply_kernel(x_ref, gate_ref, o_ref):
    # x_ref: (1, C, hw_tile) ; gate_ref: (1, C, 1) broadcast over the lane axis
    o_ref[...] = x_ref[...] * gate_ref[...]


# ------------------------------ wrapper ------------------------------------

def _pick_hw_tile(hw, max_tile=2048):
    # Spatial tile: a multiple of 128 (lane width) that divides H*W; otherwise
    # the full extent (BlockSpec requires divisible-by-128 or full-dim).
    if hw % 128 != 0:
        return hw
    t = min(hw, max_tile)
    while hw % t:
        t -= 128
    return t


def se_forward(x_nchw, w1, b1, w2, b2):
    B, C, H, W = x_nchw.shape
    HW = H * W
    mid = w1.shape[0]
    x3 = x_nchw.reshape(B, C, HW)       # pure reshape of NCHW: no transpose
    tile = _pick_hw_tile(HW)
    n_tiles = HW // tile

    # Pass 1: gate (B, C, 1) = sigmoid(fc2(leaky(fc1(mean_{h,w}(x)))))
    gate = pl.pallas_call(
        functools.partial(_se_gate_kernel, inv_hw=1.0 / HW),
        out_shape=jax.ShapeDtypeStruct((B, C, 1), jnp.float32),
        grid_spec=pltpu.PrefetchScalarGridSpec(
            num_scalar_prefetch=0,
            grid=(B, n_tiles),
            in_specs=[
                pl.BlockSpec((1, C, tile), lambda b, t: (b, 0, t)),
                pl.BlockSpec((mid, C), lambda b, t: (0, 0)),
                pl.BlockSpec((mid, 1), lambda b, t: (0, 0)),
                pl.BlockSpec((C, mid), lambda b, t: (0, 0)),
                pl.BlockSpec((C, 1), lambda b, t: (0, 0)),
            ],
            out_specs=pl.BlockSpec((1, C, 1), lambda b, t: (b, 0, 0)),
            scratch_shapes=[pltpu.VMEM((C, 1), jnp.float32)],
        ),
        compiler_params=pltpu.CompilerParams(
            dimension_semantics=("parallel", "arbitrary")),
    )(x3, w1, b1.reshape(mid, 1), w2, b2.reshape(C, 1))

    # Pass 2: out = x * gate  (gate broadcast over the spatial/lane axis)
    out = pl.pallas_call(
        _se_apply_kernel,
        out_shape=jax.ShapeDtypeStruct((B, C, HW), jnp.float32),
        grid_spec=pltpu.PrefetchScalarGridSpec(
            num_scalar_prefetch=0,
            grid=(B, n_tiles),
            in_specs=[
                pl.BlockSpec((1, C, tile), lambda b, t: (b, 0, t)),
                pl.BlockSpec((1, C, 1), lambda b, t: (b, 0, 0)),
            ],
            out_specs=pl.BlockSpec((1, C, tile), lambda b, t: (b, 0, t)),
        ),
        compiler_params=pltpu.CompilerParams(
            dimension_semantics=("parallel", "parallel")),
    )(x3, gate)

    return out.reshape(B, C, H, W)


# ----------------------------- reference (pure JAX) -------------------------

def se_reference(x, w1, b1, w2, b2):
    y = jnp.mean(x, axis=(2, 3))                      # (B, C)
    y = y @ w1.T + b1
    y = jnp.maximum(y, NEG_SLOPE * y)
    y = y @ w2.T + b2
    y = jax.nn.sigmoid(y)
    return x * y[:, :, None, None]


if __name__ == "__main__":
    key = jax.random.PRNGKey(0)
    kx, k1, k2, k3, k4 = jax.random.split(key, 5)

    B, C, H, W = 2, 32, 16, 16
    reduction = 4
    mid = int(C / reduction)

    x = jax.random.normal(kx, (B, C, H, W), jnp.float32)
    # PyTorch nn.Linear layout: weight (out_features, in_features), y = x @ W.T + b
    w1 = 0.1 * jax.random.normal(k1, (mid, C), jnp.float32)
    b1 = 0.05 * jax.random.normal(k2, (mid,), jnp.float32)
    w2 = 0.1 * jax.random.normal(k3, (C, mid), jnp.float32)
    b2 = 0.05 * jax.random.normal(k4, (C,), jnp.float32)

    fwd = jax.jit(se_forward)
    out = fwd(x, w1, b1, w2, b2)
    jax.block_until_ready(out)

    ref = se_reference(x, w1, b1, w2, b2)
    assert out.shape == (B, C, H, W) and out.dtype == jnp.float32
    err = float(jnp.max(jnp.abs(out - ref)))
    assert jnp.allclose(out, ref, atol=1e-5, rtol=1e-5), f"max |err| = {err}"
    print("KERNEL_OK")
</pallas_src>

<mosaic_0001>
module attributes {stable_mosaic.version = 11 : i64} {
  func.func @_se_apply_kernel(%arg0: i32, %arg1: i32, %arg2: memref<1x32x256xf32, #tpu.memory_space<vmem>>, %arg3: memref<1x32x1xf32, #tpu.memory_space<vmem>>, %arg4: memref<1x32x256xf32, #tpu.memory_space<vmem>>) attributes {dimension_semantics = [#tpu.dimension_semantics<parallel>, #tpu.dimension_semantics<parallel>], iteration_bounds = array<i64: 2, 1>, scalar_prefetch = 0 : i64, scratch_operands = 0 : i64, tpu.core_type = #tpu.core_type<tc>, window_params = [{transform_indices = @transform_0, window_bounds = array<i64: 1, 32, 256>}, {transform_indices = @transform_1, window_bounds = array<i64: 1, 32, 1>}, {transform_indices = @transform_2, window_bounds = array<i64: 1, 32, 256>}]} {
    %c0 = arith.constant 0 : index
    %c0_0 = arith.constant 0 : index
    %c0_1 = arith.constant 0 : index
    %0 = vector.load %arg2[%c0, %c0_0, %c0_1] : memref<1x32x256xf32, #tpu.memory_space<vmem>>, vector<1x32x256xf32>
    %c0_2 = arith.constant 0 : index
    %c0_3 = arith.constant 0 : index
    %c0_4 = arith.constant 0 : index
    %1 = vector.load %arg3[%c0_2, %c0_3, %c0_4] : memref<1x32x1xf32, #tpu.memory_space<vmem>>, vector<1x32x1xf32>
    %2 = vector.broadcast %1 : vector<1x32x1xf32> to vector<1x32x256xf32>
    %3 = arith.mulf %0, %2 : vector<1x32x256xf32>
    %c0_5 = arith.constant 0 : index
    %c0_6 = arith.constant 0 : index
    %c0_7 = arith.constant 0 : index
    %4 = vector.load %arg4[%c0_5, %c0_6, %c0_7] : memref<1x32x256xf32, #tpu.memory_space<vmem>>, vector<1x32x256xf32>
    tpu.vector_store %arg4[%c0_5, %c0_6, %c0_7], %3 {strides = array<i32>} : memref<1x32x256xf32, #tpu.memory_space<vmem>>, vector<1x32x256xf32>,
    return
  }
  func.func @transform_0(%arg0: i32, %arg1: i32) -> (i32, i32, i32) {
    %c0_i32 = arith.constant 0 : i32
    %c0_i32_0 = arith.constant 0 : i32
    return %arg0, %c0_i32, %arg1 : i32, i32, i32
  }
  func.func @transform_1(%arg0: i32, %arg1: i32) -> (i32, i32, i32) {
    %c0_i32 = arith.constant 0 : i32
    %c0_i32_0 = arith.constant 0 : i32
    %c0_i32_1 = arith.constant 0 : i32
    return %arg0, %c0_i32, %c0_i32_0 : i32, i32, i32
  }
  func.func @transform_2(%arg0: i32, %arg1: i32) -> (i32, i32, i32) {
    %c0_i32 = arith.constant 0 : i32
    %c0_i32_0 = arith.constant 0 : i32
    return %arg0, %c0_i32, %arg1 : i32, i32, i32
  }
}

module attributes {stable_mosaic.version = 11 : i64} {
  func.func @_se_gate_kernel(%arg0: i32, %arg1: i32, %arg2: memref<1x32x256xf32, #tpu.memory_space<vmem>>, %arg3: memref<8x32xf32, #tpu.memory_space<vmem>>, %arg4: memref<8x1xf32, #tpu.memory_space<vmem>>, %arg5: memref<32x8xf32, #tpu.memory_space<vmem>>, %arg6: memref<32x1xf32, #tpu.memory_space<vmem>>, %arg7: memref<1x32x1xf32, #tpu.memory_space<vmem>>, %arg8: memref<32x1xf32, #tpu.memory_space<vmem>>) attributes {dimension_semantics = [#tpu.dimension_semantics<parallel>, #tpu.dimension_semantics<arbitrary>], iteration_bounds = array<i64: 2, 1>, scalar_prefetch = 0 : i64, scratch_operands = 1 : i64, tpu.core_type = #tpu.core_type<tc>, window_params = [{transform_indices = @transform_0, window_bounds = array<i64: 1, 32, 256>}, {pipeline_mode = #tpu.pipeline_mode<synchronous>, transform_indices = @transform_1, window_bounds = array<i64: 8, 32>}, {pipeline_mode = #tpu.pipeline_mode<synchronous>, transform_indices = @transform_2, window_bounds = array<i64: 8, 1>}, {pipeline_mode = #tpu.pipeline_mode<synchronous>, transform_indices = @transform_3, window_bounds = array<i64: 32, 8>}, {pipeline_mode = #tpu.pipeline_mode<synchronous>, transform_indices = @transform_4, window_bounds = array<i64: 32, 1>}, {transform_indices = @transform_5, window_bounds = array<i64: 1, 32, 1>}]} {
    %c0_i32 = arith.constant 0 : i32
    %0 = arith.cmpi eq, %arg1, %c0_i32 : i32
    %1 = arith.extui %0 : i1 to i32
    %c0_i32_0 = arith.constant 0 : i32
    %2 = arith.cmpi ne, %1, %c0_i32_0 : i32
    scf.if %2 {
      %cst_9 = arith.constant 0.000000e+00 : f32
      %13 = vector.broadcast %cst_9 : f32 to vector<32x1xf32>
      %c0_10 = arith.constant 0 : index
      %c0_11 = arith.constant 0 : index
      %14 = vector.load %arg8[%c0_10, %c0_11] : memref<32x1xf32, #tpu.memory_space<vmem>>, vector<32x1xf32>
      tpu.vector_store %arg8[%c0_10, %c0_11], %13 {strides = array<i32>} : memref<32x1xf32, #tpu.memory_space<vmem>>, vector<32x1xf32>,
    } else {
    }
    %c0 = arith.constant 0 : index
    %c0_1 = arith.constant 0 : index
    %3 = vector.load %arg8[%c0, %c0_1] : memref<32x1xf32, #tpu.memory_space<vmem>>, vector<32x1xf32>
    %c0_2 = arith.constant 0 : index
    %c0_3 = arith.constant 0 : index
    %c0_4 = arith.constant 0 : index
    %4 = vector.load %arg2[%c0_2, %c0_3, %c0_4] : memref<1x32x256xf32, #tpu.memory_space<vmem>>, vector<1x32x256xf32>
    %5 = vector.shape_cast %4 : vector<1x32x256xf32> to vector<32x256xf32>
    %cst = arith.constant dense<0.000000e+00> : vector<32xf32>
    %6 = vector.multi_reduction <add>, %5, %cst [1] : vector<32x256xf32> to vector<32xf32>
    %7 = vector.shape_cast %6 : vector<32xf32> to vector<32x1xf32>
    %8 = arith.addf %3, %7 : vector<32x1xf32>
    %c0_5 = arith.constant 0 : index
    %c0_6 = arith.constant 0 : index
    %9 = vector.load %arg8[%c0_5, %c0_6] : memref<32x1xf32, #tpu.memory_space<vmem>>, vector<32x1xf32>
    tpu.vector_store %arg8[%c0_5, %c0_6], %8 {strides = array<i32>} : memref<32x1xf32, #tpu.memory_space<vmem>>, vector<32x1xf32>,
    %c0_i32_7 = arith.constant 0 : i32
    %10 = arith.cmpi eq, %arg1, %c0_i32_7 : i32
    %11 = arith.extui %10 : i1 to i32
    %c0_i32_8 = arith.constant 0 : i32
    %12 = arith.cmpi ne, %11, %c0_i32_8 : i32
    scf.if %12 {
      %c0_9 = arith.constant 0 : index
      %c0_10 = arith.constant 0 : index
      %13 = vector.load %arg8[%c0_9, %c0_10] : memref<32x1xf32, #tpu.memory_space<vmem>>, vector<32x1xf32>
      %cst_11 = arith.constant 3.906250e-03 : f32
      %14 = vector.broadcast %cst_11 : f32 to vector<32x1xf32>
      %15 = arith.mulf %13, %14 : vector<32x1xf32>
      %c0_12 = arith.constant 0 : index
      %c0_13 = arith.constant 0 : index
      %16 = vector.load %arg3[%c0_12, %c0_13] : memref<8x32xf32, #tpu.memory_space<vmem>>, vector<8x32xf32>
      %cst_14 = arith.constant dense<0.000000e+00> : vector<8x1xf32>
      %17 = tpu.matmul %16, %15, %cst_14 {dimension_numbers = #tpu.dot_dimension_numbers<[1], [0], [0], [1], [0, 0, 1, 1], [], []>} : vector<8x32xf32>, vector<32x1xf32>, vector<8x1xf32> -> vector<8x1xf32>
      %c0_15 = arith.constant 0 : index
      %c0_16 = arith.constant 0 : index
      %18 = vector.load %arg4[%c0_15, %c0_16] : memref<8x1xf32, #tpu.memory_space<vmem>>, vector<8x1xf32>
      %19 = arith.addf %17, %18 : vector<8x1xf32>
      %cst_17 = arith.constant 2.000000e-01 : f32
      %20 = vector.broadcast %cst_17 : f32 to vector<8x1xf32>
      %21 = arith.mulf %20, %19 : vector<8x1xf32>
      %22 = arith.maximumf %19, %21 : vector<8x1xf32>
      %c0_18 = arith.constant 0 : index
      %c0_19 = arith.constant 0 : index
      %23 = vector.load %arg5[%c0_18, %c0_19] : memref<32x8xf32, #tpu.memory_space<vmem>>, vector<32x8xf32>
      %cst_20 = arith.constant dense<0.000000e+00> : vector<32x1xf32>
      %24 = tpu.matmul %23, %22, %cst_20 {dimension_numbers = #tpu.dot_dimension_numbers<[1], [0], [0], [1], [0, 0, 1, 1], [], []>} : vector<32x8xf32>, vector<8x1xf32>, vector<32x1xf32> -> vector<32x1xf32>
      %c0_21 = arith.constant 0 : index
      %c0_22 = arith.constant 0 : index
      %25 = vector.load %arg6[%c0_21, %c0_22] : memref<32x1xf32, #tpu.memory_space<vmem>>, vector<32x1xf32>
      %26 = arith.addf %24, %25 : vector<32x1xf32>
      %27 = arith.negf %26 : vector<32x1xf32>
      %28 = math.exp %27 : vector<32x1xf32>
      %cst_23 = arith.constant 1.000000e+00 : f32
      %29 = vector.broadcast %cst_23 : f32 to vector<32x1xf32>
      %30 = arith.addf %29, %28 : vector<32x1xf32>
      %31 = arith.divf %29, %30 : vector<32x1xf32>
      %c0_24 = arith.constant 0 : index
      %c0_25 = arith.constant 0 : index
      %c0_26 = arith.constant 0 : index
      %32 = vector.load %arg7[%c0_24, %c0_25, %c0_26] : memref<1x32x1xf32, #tpu.memory_space<vmem>>, vector<1x32x1xf32>
      %33 = vector.shape_cast %32 : vector<1x32x1xf32> to vector<32x1xf32>
      %34 = vector.shape_cast %31 : vector<32x1xf32> to vector<1x32x1xf32>
      tpu.vector_store %arg7[%c0_24, %c0_25, %c0_26], %34 {strides = array<i32>} : memref<1x32x1xf32, #tpu.memory_space<vmem>>, vector<1x32x1xf32>,
    } else {
    }
    return
  }
  func.func @transform_0(%arg0: i32, %arg1: i32) -> (i32, i32, i32) {
    %c0_i32 = arith.constant 0 : i32
    %c0_i32_0 = arith.constant 0 : i32
    return %arg0, %c0_i32, %arg1 : i32, i32, i32
  }
  func.func @transform_1(%arg0: i32, %arg1: i32) -> (i32, i32) {
    %c0_i32 = arith.constant 0 : i32
    %c0_i32_0 = arith.constant 0 : i32
    %c0_i32_1 = arith.constant 0 : i32
    return %c0_i32, %c0_i32_0 : i32, i32
  }
  func.func @transform_2(%arg0: i32, %arg1: i32) -> (i32, i32) {
    %c0_i32 = arith.constant 0 : i32
    %c0_i32_0 = arith.constant 0 : i32
    %c0_i32_1 = arith.constant 0 : i32
    return %c0_i32, %c0_i32_0 : i32, i32
  }
  func.func @transform_3(%arg0: i32, %arg1: i32) -> (i32, i32) {
    %c0_i32 = arith.constant 0 : i32
    %c0_i32_0 = arith.constant 0 : i32
    %c0_i32_1 = arith.constant 0 : i32
    return %c0_i32, %c0_i32_0 : i32, i32
  }
  func.func @transform_4(%arg0: i32, %arg1: i32) -> (i32, i32) {
    %c0_i32 = arith.constant 0 : i32
    %c0_i32_0 = arith.constant 0 : i32
    %c0_i32_1 = arith.constant 0 : i32
    return %c0_i32, %c0_i32_0 : i32, i32
  }
  func.func @transform_5(%arg0: i32, %arg1: i32) -> (i32, i32, i32) {
    %c0_i32 = arith.constant 0 : i32
    %c0_i32_0 = arith.constant 0 : i32
    %c0_i32_1 = arith.constant 0 : i32
    return %arg0, %c0_i32, %c0_i32_0 : i32, i32, i32
  }
}

</mosaic_0001>

<bundles_post_ra>
// kernel: se_forward.3
= control target key start
LH: loop header
LB: loop body
LE: loop exit
PB: predicated region body
PF: predicated region fallthrough
CT: control target
= control target key end

     0   :  { %s433_s9 = smov 0   ;;  %s435_s10 = smov 0   ;;  %s469_s0 = inlined_call_operand.vmem [shape: f32[2,32,256], index: 0, kind: input, shape index: {}]   ;;  %s470_s1 = inlined_call_operand.vmem [shape: f32[2,32,1], index: 1, kind: input, shape index: {}]   ;;  %s471_s2 = inlined_call_operand.vmem [shape: f32[2,32,256], index: 2, kind: output, shape index: {}]  }
   0x1   :  { %s437_s11 = smov 0  }
   0x2 LB: > { %s24_s12 = sadd.s32 1, %s411_s10  ;;  %p354_p0 = scmp.ge.s32.totalorder %s415_s11, 1  ;;  %s415_s11 = sphi %s437_s11, %s12_s11   ;;  %s411_s10 = sphi %s435_s10, %s473_s10   ;;  %s407_s9 = sphi %s433_s9, %s472_s9  }
   0x3   : > { %p26_p1 = scmp.ge.s32.totalorder %s24_s12, 2  ;;  %p143_p2 = scmp.lt.s32.totalorder %s415_s11, 3 }
   0x5   : > { %s475_s12 = smov (%p26_p1, %s24_s12), 0  ;;  %p144_p3 = pnand %p354_p0, %p143_p2 }
   0x6   : > { %p179_p4 = scmp.lt.s32.totalorder (!%p144_p3), %s407_s9, 1 }
   0x7   : > { %147 = sbr.rel (%p144_p3) target bundleno = 148 (0x94), region = 28 }
   0xc   : > { %v417_v0 = vmov 0   ;;  %s477_s9 = smov (!%p179_p4, %s407_s9), 1 }
   0xd   : > { %392 = vset.pattern.permute.xlu1 %v417_v0  ;;  %391 = vset.pattern.permute.xlu0 %v417_v0  ;;  %s364_s13 = sshll.u32 %s477_s9, 5  ;;  %s363_s17 = sshll.u32 %s477_s9, 6 }
   0xe   : > { %s192_s16 = scalar_lea.vmem %s470_s1, %s364_s13  ;;  %s186_s20 = scalar_lea.vmem %s469_s0, %s363_s17 }
   0xf   : > { %v213_v1 = vld [vmem:[%s192_s16 + $0x10] sm:$0xff]  ;;  %v211_v2 = vld [vmem:[%s192_s16] sm:$0xff]  ;;  %v214_v3 = vld [vmem:[%s192_s16 + $0x18] sm:$0xff]  ;;  %s201_s23 = scalar_lea.vmem %s471_s2, %s363_s17 }
  0x10   : > { %227 = vperm.xlu1 %392, %v213_v1   ;;  %217 = vperm.xlu0 %391, %v211_v2   ;;  %v212_v4 = vld [vmem:[%s192_s16 + $0x8] sm:$0xff]  ;;  %v207_v5 = vld [vmem:[%s186_s20 + $0x20] sm:$0xff]  ;;  %v209_v15 = vld [vmem:[%s186_s20 + $0x30] sm:$0xff] }
  0x11   : > { %v208_v6 = vld [vmem:[%s186_s20 + $0x28] sm:$0xff]  ;;  %v203_v7 = vld [vmem:[%s186_s20] sm:$0xff]  ;;  %v210_v16 = vld [vmem:[%s186_s20 + $0x38] sm:$0xff] }
  0x12   : > { %v204_v8 = vld [vmem:[%s186_s20 + $0x8] sm:$0xff]  ;;  %v205_v17 = vld [vmem:[%s186_s20 + $0x10] sm:$0xff]  ;;  %v206_v18 = vld [vmem:[%s186_s20 + $0x18] sm:$0xff] }
  0x14   : > { %232 = vperm.xlu1 %392, %v214_v3   ;;  %222 = vperm.xlu0 %391, %v212_v4  }
  0x8b   : > { %v228_v9 = vpop.permute.xlu1 %227  ;;  %v218_v10 = vpop.permute.xlu0 %217 }
  0x8c   : > { %v239_v11 = vmul.f32 %v228_v9, %v207_v5  ;;  %v240_v12 = vmul.f32 %v228_v9, %v208_v6  ;;  %v235_v13 = vmul.f32 %v218_v10, %v203_v7  ;;  %v236_v14 = vmul.f32 %v218_v10, %v204_v8 }
  0x8e   : > { %247 = vst [vmem:[%s201_s23 + $0x20] sm:$0xff] %v239_v11  ;;  %248 = vst [vmem:[%s201_s23 + $0x28] sm:$0xff] %v240_v12 }
  0x8f   : > { %243 = vst [vmem:[%s201_s23] sm:$0xff] %v235_v13  ;;  %244 = vst [vmem:[%s201_s23 + $0x8] sm:$0xff] %v236_v14  ;;  %v233_v19 = vpop.permute.xlu1 %232  ;;  %v223_v20 = vpop.permute.xlu0 %222 }
  0x90   : > { %v241_v21 = vmul.f32 %v233_v19, %v209_v15  ;;  %v242_v22 = vmul.f32 %v233_v19, %v210_v16  ;;  %v237_v23 = vmul.f32 %v223_v20, %v205_v17  ;;  %v238_v24 = vmul.f32 %v223_v20, %v206_v18 }
  0x92   : > { %249 = vst [vmem:[%s201_s23 + $0x30] sm:$0xff] %v241_v21  ;;  %250 = vst [vmem:[%s201_s23 + $0x38] sm:$0xff] %v242_v22 }
  0x93   : > { %245 = vst [vmem:[%s201_s23 + $0x10] sm:$0xff] %v237_v23  ;;  %246 = vst [vmem:[%s201_s23 + $0x18] sm:$0xff] %v238_v24 }
  0x94 PF: > { %s12_s11 = sadd.s32 1, %s415_s11   ;;  %s472_s9 = smov %s411_s10 }
  0x95   : > { %p9_p5 = scmp.ge.s32.totalorder %s12_s11, 4   ;;  %s473_s10 = smov %s475_s12 }
  0x97   :  { %11 = sbr.rel (!%p9_p5) target bundleno = 2 (0x2), region = 61 }

// kernel: se_forward.2
= control target key start
LH: loop header
LB: loop body
LE: loop exit
PB: predicated region body
PF: predicated region fallthrough
CT: control target
= control target key end

     0   :  { %s736_s18 = smov 0   ;;  %s738_s19 = smov 0   ;;  %s815_s0 = inlined_call_operand.vmem [shape: f32[2,32,256], index: 0, kind: input, shape index: {}]   ;;  %s816_s1 = inlined_call_operand.vmem [shape: f32[8,32], index: 1, kind: input, shape index: {}]   ;;  %s817_s2 = inlined_call_operand.vmem [shape: f32[8,1], index: 2, kind: input, shape index: {}]   ;;  %s818_s3 = inlined_call_operand.vmem [shape: f32[32,8], index: 3, kind: input, shape index: {}]   ;;  %s819_s4 = inlined_call_operand.vmem [shape: f32[32,1], index: 4, kind: input, shape index: {}]   ;;  %s820_s5 = inlined_call_operand.vmem [shape: f32[2,32,1], index: 5, kind: output, shape index: {}]  }
   0x1   :  { %s740_s20 = smov 0  }
   0x2 LB: > { %s27_s21 = sadd.s32 1, %s698_s19  ;;  %p591_p0 = scmp.ge.s32.totalorder %s702_s20, 1  ;;  %s702_s20 = sphi %s740_s20, %s15_s20   ;;  %s698_s19 = sphi %s738_s19, %s822_s19   ;;  %s694_s18 = sphi %s736_s18, %s821_s18  }
   0x3   : > { %p29_p1 = scmp.ge.s32.totalorder %s27_s21, 2  ;;  %p206_p2 = scmp.lt.s32.totalorder %s702_s20, 3 }
   0x5   : > { %s824_s21 = smov (%p29_p1, %s27_s21), 0  ;;  %p207_p3 = pnand %p591_p0, %p206_p2 }
   0x6   : > { %p239_p4 = scmp.lt.s32.totalorder (!%p207_p3), %s694_s18, 1 }
   0x7   : > { %210 = sbr.rel (%p207_p3) target bundleno = 612 (0x264), region = 40 }
   0xc   : > { %vm257_vm0 = vcmask 7168   ;;  %v704_v0 = vmov 0.0   ;;  %s826_s18 = smov (!%p239_p4, %s694_s18), 1  ;;  %vm705_vm1 = vmmov 0   ;;  %v306_v33 = vld [vmem:[%s816_s1] sm:$0xff]  ;;  %vm308_vm2 = vcmask 261120  }
   0xd   : > { %261 = vst.msk [vmem:[#allocation2 + $0x18] sm:$0xff] %vm257_vm0, %v704_v0  ;;  %258 = vst.msk [vmem:[#allocation2] sm:$0xff] %vm257_vm0, %v704_v0  ;;  %619 = vmatprep.subr.mxu0 %v704_v0  ;;  %s607_s22 = sshll.u32 %s826_s18, 6  ;;  %627 = vmatprep.mubr.msk.f32.mxu0 %vm705_vm1, %v704_v0  ;;  %v384_v34 = vld [vmem:[%s818_s3] sm:$0xff]  ;;  %vm392_vm3 = vcmask 64512   ;;  %v385_v41 = vld [vmem:[%s818_s3 + $0x8] sm:$0xff] }
   0xe   : > { %259 = vst.msk [vmem:[#allocation2 + $0x8] sm:$0xff] %vm257_vm0, %v704_v0  ;;  %260 = vst.msk [vmem:[#allocation2 + $0x10] sm:$0xff] %vm257_vm0, %v704_v0  ;;  %s246_s25 = scalar_lea.vmem %s815_s0, %s607_s22  ;;  %632 = vmatprep.mubr.msk.f32.mxu1 %vm392_vm3, %v384_v34  ;;  %v307_v35 = vld [vmem:[%s817_s2] sm:$0xff]  ;;  %v386_v42 = vld [vmem:[%s818_s3 + $0x10] sm:$0xff] }
   0xf   : > { %v272_v1 = vld [vmem:[%s246_s25 + $0x30] sm:$0xff]  ;;  %v273_v2 = vld [vmem:[%s246_s25 + $0x38] sm:$0xff]  ;;  %v270_v3 = vld [vmem:[%s246_s25 + $0x20] sm:$0xff] }
  0x10   : > { %v283_v4 = vadd.f32 %v273_v2, %v272_v1  ;;  %v271_v5 = vld [vmem:[%s246_s25 + $0x28] sm:$0xff]  ;;  %v268_v6 = vld [vmem:[%s246_s25 + $0x10] sm:$0xff]  ;;  %v269_v7 = vld [vmem:[%s246_s25 + $0x18] sm:$0xff] }
  0x11   : > { %v277_v8 = vadd.f32 %v269_v7, %v268_v6  ;;  %v266_v9 = vld [vmem:[%s246_s25] sm:$0xff]  ;;  %v267_v10 = vld [vmem:[%s246_s25 + $0x8] sm:$0xff]  ;;  %v280_v11 = vadd.f32 %v271_v5, %v270_v3  ;;  %v387_v43 = vld [vmem:[%s818_s3 + $0x18] sm:$0xff]  ;;  %s608_s25 = sshll.u32 %s826_s18, 5 }
  0x12   : > { %284 = vadd.xlane.f32.xlu0 %v283_v4  ;;  %v274_v12 = vadd.f32 %v267_v10, %v266_v9  ;;  %v389_v44 = vld [vmem:[%s819_s4 + $0x8] sm:$0xff]  ;;  %v388_v46 = vld [vmem:[%s819_s4] sm:$0xff]  ;;  %v391_v49 = vld [vmem:[%s819_s4 + $0x18] sm:$0xff]  ;;  %s252_s28 = scalar_lea.vmem %s820_s5, %s608_s25 }
  0x13   : > { %278 = vadd.xlane.f32.xlu1 %v277_v8  ;;  %v390_v53 = vld [vmem:[%s819_s4 + $0x10] sm:$0xff] }
  0x14   : > { %v265_v13 = vld [vmem:[#allocation2 + $0x18] sm:$0xff]  ;;  %v262_v20 = vld [vmem:[#allocation2] sm:$0xff] }
  0x15   : > { %v263_v14 = vld [vmem:[#allocation2 + $0x8] sm:$0xff]  ;;  %v264_v18 = vld [vmem:[#allocation2 + $0x10] sm:$0xff] }
  0x16   : > { %281 = vadd.xlane.f32.xlu0 %v280_v11 }
  0x17   : > { %275 = vadd.xlane.f32.xlu1 %v274_v12 }
  0x9b   : > { %v285_v15 = vpop.xlane.xlu0 %284 }
  0x9c   : > { %v289_v16 = vadd.f32 %v285_v15, %v265_v13  ;;  %v279_v17 = vpop.xlane.xlu1 %278 }
  0x9d   : > { %v287_v19 = vadd.f32 %v279_v17, %v263_v14 }
  0x9e   : > { %294 = vst.msk [vmem:[#allocation2 + $0x18] sm:$0xff] %vm257_vm0, %v289_v16 }
  0x9f   : > { %v282_v21 = vpop.xlane.xlu0 %281  ;;  %292 = vst.msk [vmem:[#allocation2 + $0x8] sm:$0xff] %vm257_vm0, %v287_v19 }
  0xa0   : > { %v288_v22 = vadd.f32 %v282_v21, %v264_v18  ;;  %v276_v23 = vpop.xlane.xlu1 %275 }
  0xa1   : > { %v286_v24 = vadd.f32 %v276_v23, %v262_v20 }
  0xa2   : > { %293 = vst.msk [vmem:[#allocation2 + $0x10] sm:$0xff] %vm257_vm0, %v288_v22 }
  0xa3   : > { %291 = vst.msk [vmem:[#allocation2] sm:$0xff] %vm257_vm0, %v286_v24 }
  0xa5   : > { %v301_v25 = vld [vmem:[#allocation2 + $0x18] sm:$0xff] }
  0xa6   : > { %v305_v26 = vmul.f32 0.00390625, %v301_v25  ;;  %v299_v28 = vld [vmem:[#allocation2 + $0x8] sm:$0xff] }
  0xa7   : > { %v303_v31 = vmul.f32 0.00390625, %v299_v28 }
  0xa8   : > { %620 = vmatpush3.msra.mxu0 %v305_v26 }
  0xa9   : > { %621 = vmatprep.subr.mxu0 %v704_v0  ;;  %v300_v27 = vld [vmem:[#allocation2 + $0x10] sm:$0xff] }
  0xaa   : > { %v304_v29 = vmul.f32 0.00390625, %v300_v27  ;;  %v298_v30 = vld [vmem:[#allocation2] sm:$0xff] }
  0xab   : > { %v302_v32 = vmul.f32 0.00390625, %v298_v30 }
  0xac   : > { %622 = vmatpush3.msra.mxu0 %v304_v29 }
  0xad   : > { %623 = vmatprep.subr.mxu0 %v704_v0 }
  0xae   : > { %624 = vmatpush3.msra.mxu0 %v303_v31 }
  0xaf   : > { %625 = vmatprep.subr.mxu0 %v704_v0 }
  0xb0   : > { %626 = vmatpush3.msra.mxu0 %v302_v32 }
  0xb1   : > { %628 = vmatmul.mubr.msk.f32.vlgmr.msra.gmra.mxu0 %vm308_vm2, %v306_v33 }
 0x171   : > { %v378_v36 = vpop.f32.mrf.mxu0 }
 0x172   : > { %v379_v37 = vadd.f32 %v378_v36, %v307_v35 }
 0x173   : > { %v629_v38 = vpop.f32.mrf.mxu0 }
 0x174   : > { %v382_v39 = vmul.f32 0.2, %v379_v37 }
 0x176   : > { %v383_v40 = vmax.f32 %v379_v37, %v382_v39 }
 0x178   : > { %630 = vmatprep.subr.mxu1 %v383_v40 }
 0x179   : > { %631 = vmatpush3.msra.mxu1 %v383_v40 }
 0x17a   : > { %633 = vmatmul.mubr.msk.f32.vlgmr.msra.gmra.mxu1 %vm392_vm3, %v385_v41 }
 0x17b   : > { %635 = vmatprep.mubr.msk.f32.mxu1 %vm392_vm3, %v386_v42 }
 0x17e   : > { %636 = vmatmul.mubr.msk.f32.gmra.mxu1 %vm392_vm3, %v387_v43 }
 0x23a   : > { %v634_v45 = vpop.f32.mrf.mxu1 }
 0x23b   : > { %v477_v47 = vadd.f32 %v634_v45, %v389_v44 }
 0x23c   : > { %v471_v48 = vpop.f32.mrf.mxu1 }
 0x23d   : > { %v602_v50 = vmul.f32 -1.442695, %v477_v47  ;;  %v472_v51 = vadd.f32 %v471_v48, %v388_v46 }
 0x23e   : > { %v637_v52 = vpop.f32.mrf.mxu1 }
 0x23f   : > { %664 = vpow2.f32 %v602_v50  ;;  %v601_v54 = vmul.f32 -1.442695, %v472_v51  ;;  %v487_v55 = vadd.f32 %v637_v52, %v391_v49 }
 0x240   : > { %v481_v56 = vpop.f32.mrf.mxu1 }
 0x241   : > { %666 = vpow2.f32 %v601_v54  ;;  %v604_v57 = vmul.f32 -1.442695, %v487_v55  ;;  %v482_v58 = vadd.f32 %v481_v56, %v390_v53 }
 0x243   : > { %668 = vpow2.f32 %v604_v57  ;;  %v603_v59 = vmul.f32 -1.442695, %v482_v58 }
 0x245   : > { %670 = vpow2.f32 %v603_v59 }
 0x24c   : > { %v665_v60 = vpop.eup %664 }
 0x24d   : > { %v503_v61 = vadd.f32 1.0, %v665_v60 }
 0x24e   : > { %v667_v62 = vpop.eup %666 }
 0x24f   : > { %672 = vrcp.f32 %v503_v61  ;;  %v502_v63 = vadd.f32 1.0, %v667_v62 }
 0x250   : > { %v669_v0 = vpop.eup %668 }
 0x251   : > { %674 = vrcp.f32 %v502_v63  ;;  %v505_v1 = vadd.f32 1.0, %v669_v0 }
 0x252   : > { %v671_v2 = vpop.eup %670 }
 0x253   : > { %676 = vrcp.f32 %v505_v1  ;;  %v504_v3 = vadd.f32 1.0, %v671_v2 }
 0x255   : > { %678 = vrcp.f32 %v504_v3 }
 0x25c   : > { %v673_v4 = vpop.eup %672 }
 0x25d   : > { %515 = vst.msk [vmem:[%s252_s28 + $0x8] sm:$0xff] %vm257_vm0, %v673_v4 }
 0x25e   : > { %v675_v5 = vpop.eup %674 }
 0x25f   : > { %514 = vst.msk [vmem:[%s252_s28] sm:$0xff] %vm257_vm0, %v675_v5 }
 0x260   : > { %v677_v6 = vpop.eup %676 }
 0x261   : > { %517 = vst.msk [vmem:[%s252_s28 + $0x18] sm:$0xff] %vm257_vm0, %v677_v6 }
 0x262   : > { %v679_v7 = vpop.eup %678 }
 0x263   : > { %516 = vst.msk [vmem:[%s252_s28 + $0x10] sm:$0xff] %vm257_vm0, %v679_v7 }
 0x264 PF: > { %s15_s20 = sadd.s32 1, %s702_s20   ;;  %s821_s18 = smov %s698_s19 }
 0x265   : > { %p12_p5 = scmp.ge.s32.totalorder %s15_s20, 4   ;;  %s822_s19 = smov %s824_s21 }
 0x267   :  { %14 = sbr.rel (!%p12_p5) target bundleno = 2 (0x2), region = 78 }

</bundles_post_ra>
